<compile_context>
chip_gen: v5e
topology: v5e:2x2
jax: 0.10.0
libtpu: 0.0.40
codegen_flags: <defaults>
</compile_context>

<pallas_src>
import functools

import jax
import jax.numpy as jnp
from jax.experimental import pallas as pl
from jax.experimental.pallas import tpu as pltpu

HIDDEN = 512   # fixed by the PyTorch module
LANE = 128     # TPU lane width


def _mlp_kernel(x_ref, w1_ref, b1_ref, w2_ref, b2_ref, w3_ref, b3_ref, o_ref):
    # In-kernel fp32 -> bf16 cast of the activation tile (free: co-issues under MXU).
    x = x_ref[...].astype(jnp.bfloat16)
    # Layer 1: (TB, Din) bf16 @ (Din, 512) bf16 -> fp32 accumulate, fp32 bias add.
    h1 = jnp.dot(x, w1_ref[...], preferred_element_type=jnp.float32) + b1_ref[...]
    # Dropout: identity at inference (nn.Dropout is a no-op in eval mode).
    # TODO(synk): training-mode dropout would use pltpu.prng_seed + pltpu.stateful_bernoulli.
    # Layer 2: dominant matmul (512x512), bf16 operands, fp32 accumulation.
    h2 = jnp.dot(h1.astype(jnp.bfloat16), w2_ref[...],
                 preferred_element_type=jnp.float32) + b2_ref[...]
    # Layer 3: (TB, 512) bf16 @ (512, Dout_pad) bf16 -> fp32.
    out = jnp.dot(h2.astype(jnp.bfloat16), w3_ref[...],
                  preferred_element_type=jnp.float32) + b3_ref[...]
    o_ref[...] = out.astype(o_ref.dtype)


def _round_up(n, m):
    return ((n + m - 1) // m) * m


@functools.partial(jax.jit, static_argnames=("tile_b", "out_dtype"))
def feedforward_nn(x, w1, b1, w2, b2, w3, b3, *, tile_b=512, out_dtype=jnp.float32):
    """Fused 3-layer MLP forward.

    x : (B, Din) float32 (cast to bf16 inside the kernel)
    w1: (Din, 512), b1: (1, 512)
    w2: (512, 512), b2: (1, 512)
    w3: (512, Dout), b3: (1, Dout)
    returns (B, Dout) out_dtype (fp32 default; bf16 halves output HBM traffic)
    """
    B, din = x.shape
    dout = w3.shape[1]
    dout_pad = _round_up(dout, LANE)   # lane-dense (unmasked) stores; no further padding

    # Effective batch tile: multiple of 8 (fp32 sublanes), never bigger than needed.
    tb = min(tile_b, _round_up(B, 8))
    # Megacore (v7x, 2 TCs): once B is large enough, cap the tile so the batch grid has
    # at least 2 steps and ("parallel",) can shard them across cores.
    if B >= 512:
        tb = min(tb, _round_up(pl.cdiv(B, 2), 8))
    grid = (pl.cdiv(B, tb),)   # ragged last tile: Pallas masks its output stores

    # Weights in bf16 (MXU operand dtype); biases stay fp32 (fp32 bias add, single
    # final cast — v5e VPU has no bf16 path). Only w3/b3 need lane padding.
    w1_b = w1.astype(jnp.bfloat16)
    w2_b = w2.astype(jnp.bfloat16)
    w3_p = jnp.zeros((HIDDEN, dout_pad), jnp.bfloat16).at[:, :dout].set(
        w3.astype(jnp.bfloat16))
    b1_f = b1.astype(jnp.float32)
    b2_f = b2.astype(jnp.float32)
    b3_p = jnp.zeros((1, dout_pad), jnp.float32).at[:, :dout].set(
        b3.astype(jnp.float32))

    # Constant index_map -> weights/biases are DMA'd from HBM once and stay
    # VMEM-resident across all batch tiles; x/out tiles are software-pipelined.
    # (If din grows into the MiB range, add pipeline_mode=pl.Buffered(1) here so
    #  resident blocks are not pointlessly double-buffered; irrelevant at this size.)
    resident = lambda shape: pl.BlockSpec(shape, lambda i: (0, 0))

    out_p = pl.pallas_call(
        _mlp_kernel,
        out_shape=jax.ShapeDtypeStruct((B, dout_pad), out_dtype),
        grid=grid,
        in_specs=[
            pl.BlockSpec((tb, din), lambda i: (i, 0)),   # x: tiled over batch, fp32
            resident((din, HIDDEN)),                     # w1
            resident((1, HIDDEN)),                       # b1
            resident((HIDDEN, HIDDEN)),                  # w2
            resident((1, HIDDEN)),                       # b2
            resident((HIDDEN, dout_pad)),                # w3 (lane-padded)
            resident((1, dout_pad)),                     # b3 (lane-padded)
        ],
        out_specs=pl.BlockSpec((tb, dout_pad), lambda i: (i, 0)),
        compiler_params=pltpu.CompilerParams(
            # Batch tiles are independent -> shard across both TensorCores on v7x.
            dimension_semantics=("parallel",),
            # No explicit vmem_limit_bytes: even at tile_b=512 the footprint
            # (x/out double-buffers + fp32 h1/h2 + <1 MiB resident weights) is a few
            # MiB, well inside the default scoped VMEM on v5e/v6e/v7x.
        ),
    )(x, w1_b, b1_f, w2_b, b2_f, w3_p, b3_p)

    # Only the lane padding is sliced off (no batch slice: output is exactly B rows).
    return out_p[:, :dout]


def init_params(key, in_channel, output, hidden=HIDDEN):
    """PyTorch-style uniform init; weights stored as (fan_in, fan_out), fp32."""
    ks = jax.random.split(key, 6)

    def lin(kw, kb, fan_in, fan_out):
        bound = 1.0 / jnp.sqrt(fan_in)
        w = jax.random.uniform(kw, (fan_in, fan_out), jnp.float32, -bound, bound)
        b = jax.random.uniform(kb, (1, fan_out), jnp.float32, -bound, bound)
        return w, b

    w1, b1 = lin(ks[0], ks[1], in_channel, hidden)
    w2, b2 = lin(ks[2], ks[3], hidden, hidden)
    w3, b3 = lin(ks[4], ks[5], hidden, output)
    return w1, b1, w2, b2, w3, b3


def _reference(x, params):
    """Plain-JAX reference with the same bf16-operand / fp32-accumulate math."""
    w1, b1, w2, b2, w3, b3 = params
    xb = x.astype(jnp.bfloat16)
    h1 = jnp.dot(xb, w1.astype(jnp.bfloat16),
                 preferred_element_type=jnp.float32) + b1
    h2 = jnp.dot(h1.astype(jnp.bfloat16), w2.astype(jnp.bfloat16),
                 preferred_element_type=jnp.float32) + b2
    return jnp.dot(h2.astype(jnp.bfloat16), w3.astype(jnp.bfloat16),
                   preferred_element_type=jnp.float32) + b3


if __name__ == "__main__":
    in_channel, output, dropout = 32, 16, 0.1  # dropout unused at inference

    key = jax.random.PRNGKey(0)
    kx, kp, kx2 = jax.random.split(key, 3)
    params = init_params(kp, in_channel, output)

    # Small aligned batch.
    B = 8
    x = jax.random.normal(kx, (B, in_channel), jnp.float32)
    y = feedforward_nn(x, *params)
    jax.block_until_ready(y)
    ref = _reference(x, params)
    assert y.shape == (B, output)
    assert jnp.allclose(y, ref, atol=2e-2, rtol=2e-2), \
        float(jnp.max(jnp.abs(y - ref)))

    # Ragged batch (exercises the masked last-tile path: no batch padding in the wrapper).
    B2 = 13
    x2 = jax.random.normal(kx2, (B2, in_channel), jnp.float32)
    y2 = feedforward_nn(x2, *params)
    jax.block_until_ready(y2)
    ref2 = _reference(x2, params)
    assert y2.shape == (B2, output)
    assert jnp.allclose(y2, ref2, atol=2e-2, rtol=2e-2), \
        float(jnp.max(jnp.abs(y2 - ref2)))

    print("KERNEL_OK")
</pallas_src>

<mosaic_0001>
module attributes {stable_mosaic.version = 11 : i64} {
  func.func @_mlp_kernel(%arg0: i32, %arg1: memref<8x32xf32, #tpu.memory_space<vmem>>, %arg2: memref<32x512xbf16, #tpu.memory_space<vmem>>, %arg3: memref<1x512xf32, #tpu.memory_space<vmem>>, %arg4: memref<512x512xbf16, #tpu.memory_space<vmem>>, %arg5: memref<1x512xf32, #tpu.memory_space<vmem>>, %arg6: memref<512x128xbf16, #tpu.memory_space<vmem>>, %arg7: memref<1x128xf32, #tpu.memory_space<vmem>>, %arg8: memref<8x128xf32, #tpu.memory_space<vmem>>) attributes {dimension_semantics = [#tpu.dimension_semantics<parallel>], iteration_bounds = array<i64: 1>, scalar_prefetch = 0 : i64, scratch_operands = 0 : i64, tpu.core_type = #tpu.core_type<tc>, window_params = [{transform_indices = @transform_0, window_bounds = array<i64: 8, 32>}, {pipeline_mode = #tpu.pipeline_mode<synchronous>, transform_indices = @transform_1, window_bounds = array<i64: 32, 512>}, {pipeline_mode = #tpu.pipeline_mode<synchronous>, transform_indices = @transform_2, window_bounds = array<i64: 1, 512>}, {pipeline_mode = #tpu.pipeline_mode<synchronous>, transform_indices = @transform_3, window_bounds = array<i64: 512, 512>}, {pipeline_mode = #tpu.pipeline_mode<synchronous>, transform_indices = @transform_4, window_bounds = array<i64: 1, 512>}, {pipeline_mode = #tpu.pipeline_mode<synchronous>, transform_indices = @transform_5, window_bounds = array<i64: 512, 128>}, {pipeline_mode = #tpu.pipeline_mode<synchronous>, transform_indices = @transform_6, window_bounds = array<i64: 1, 128>}, {transform_indices = @transform_7, window_bounds = array<i64: 8, 128>}]} {
    %c0 = arith.constant 0 : index
    %c0_0 = arith.constant 0 : index
    %0 = vector.load %arg1[%c0, %c0_0] : memref<8x32xf32, #tpu.memory_space<vmem>>, vector<8x32xf32>
    %1 = arith.truncf %0 : vector<8x32xf32> to vector<8x32xbf16>
    %c0_1 = arith.constant 0 : index
    %c0_2 = arith.constant 0 : index
    %2 = vector.load %arg2[%c0_1, %c0_2] : memref<32x512xbf16, #tpu.memory_space<vmem>>, vector<32x512xbf16>
    %cst = arith.constant dense<0.000000e+00> : vector<8x512xf32>
    %3 = tpu.matmul %1, %2, %cst {dimension_numbers = #tpu.dot_dimension_numbers<[1], [0], [0], [1], [0, 0, 1, 1], [], []>} : vector<8x32xbf16>, vector<32x512xbf16>, vector<8x512xf32> -> vector<8x512xf32>
    %c0_3 = arith.constant 0 : index
    %c0_4 = arith.constant 0 : index
    %4 = vector.load %arg3[%c0_3, %c0_4] : memref<1x512xf32, #tpu.memory_space<vmem>>, vector<1x512xf32>
    %5 = vector.broadcast %4 : vector<1x512xf32> to vector<8x512xf32>
    %6 = arith.addf %3, %5 : vector<8x512xf32>
    %7 = arith.truncf %6 : vector<8x512xf32> to vector<8x512xbf16>
    %c0_5 = arith.constant 0 : index
    %c0_6 = arith.constant 0 : index
    %8 = vector.load %arg4[%c0_5, %c0_6] : memref<512x512xbf16, #tpu.memory_space<vmem>>, vector<512x512xbf16>
    %cst_7 = arith.constant dense<0.000000e+00> : vector<8x512xf32>
    %9 = tpu.matmul %7, %8, %cst_7 {dimension_numbers = #tpu.dot_dimension_numbers<[1], [0], [0], [1], [0, 0, 1, 1], [], []>} : vector<8x512xbf16>, vector<512x512xbf16>, vector<8x512xf32> -> vector<8x512xf32>
    %c0_8 = arith.constant 0 : index
    %c0_9 = arith.constant 0 : index
    %10 = vector.load %arg5[%c0_8, %c0_9] : memref<1x512xf32, #tpu.memory_space<vmem>>, vector<1x512xf32>
    %11 = vector.broadcast %10 : vector<1x512xf32> to vector<8x512xf32>
    %12 = arith.addf %9, %11 : vector<8x512xf32>
    %13 = arith.truncf %12 : vector<8x512xf32> to vector<8x512xbf16>
    %c0_10 = arith.constant 0 : index
    %c0_11 = arith.constant 0 : index
    %14 = vector.load %arg6[%c0_10, %c0_11] : memref<512x128xbf16, #tpu.memory_space<vmem>>, vector<512x128xbf16>
    %cst_12 = arith.constant dense<0.000000e+00> : vector<8x128xf32>
    %15 = tpu.matmul %13, %14, %cst_12 {dimension_numbers = #tpu.dot_dimension_numbers<[1], [0], [0], [1], [0, 0, 1, 1], [], []>} : vector<8x512xbf16>, vector<512x128xbf16>, vector<8x128xf32> -> vector<8x128xf32>
    %c0_13 = arith.constant 0 : index
    %c0_14 = arith.constant 0 : index
    %16 = vector.load %arg7[%c0_13, %c0_14] : memref<1x128xf32, #tpu.memory_space<vmem>>, vector<1x128xf32>
    %17 = vector.broadcast %16 : vector<1x128xf32> to vector<8x128xf32>
    %18 = arith.addf %15, %17 : vector<8x128xf32>
    %c0_15 = arith.constant 0 : index
    %c0_16 = arith.constant 0 : index
    %19 = vector.load %arg8[%c0_15, %c0_16] : memref<8x128xf32, #tpu.memory_space<vmem>>, vector<8x128xf32>
    tpu.vector_store %arg8[%c0_15, %c0_16], %18 {strides = array<i32>} : memref<8x128xf32, #tpu.memory_space<vmem>>, vector<8x128xf32>,
    return
  }
  func.func @transform_0(%arg0: i32) -> (i32, i32) {
    %c0_i32 = arith.constant 0 : i32
    %c0_i32_0 = arith.constant 0 : i32
    return %arg0, %c0_i32 : i32, i32
  }
  func.func @transform_1(%arg0: i32) -> (i32, i32) {
    %c0_i32 = arith.constant 0 : i32
    %c0_i32_0 = arith.constant 0 : i32
    %c0_i32_1 = arith.constant 0 : i32
    return %c0_i32, %c0_i32_0 : i32, i32
  }
  func.func @transform_2(%arg0: i32) -> (i32, i32) {
    %c0_i32 = arith.constant 0 : i32
    %c0_i32_0 = arith.constant 0 : i32
    %c0_i32_1 = arith.constant 0 : i32
    return %c0_i32, %c0_i32_0 : i32, i32
  }
  func.func @transform_3(%arg0: i32) -> (i32, i32) {
    %c0_i32 = arith.constant 0 : i32
    %c0_i32_0 = arith.constant 0 : i32
    %c0_i32_1 = arith.constant 0 : i32
    return %c0_i32, %c0_i32_0 : i32, i32
  }
  func.func @transform_4(%arg0: i32) -> (i32, i32) {
    %c0_i32 = arith.constant 0 : i32
    %c0_i32_0 = arith.constant 0 : i32
    %c0_i32_1 = arith.constant 0 : i32
    return %c0_i32, %c0_i32_0 : i32, i32
  }
  func.func @transform_5(%arg0: i32) -> (i32, i32) {
    %c0_i32 = arith.constant 0 : i32
    %c0_i32_0 = arith.constant 0 : i32
    %c0_i32_1 = arith.constant 0 : i32
    return %c0_i32, %c0_i32_0 : i32, i32
  }
  func.func @transform_6(%arg0: i32) -> (i32, i32) {
    %c0_i32 = arith.constant 0 : i32
    %c0_i32_0 = arith.constant 0 : i32
    %c0_i32_1 = arith.constant 0 : i32
    return %c0_i32, %c0_i32_0 : i32, i32
  }
  func.func @transform_7(%arg0: i32) -> (i32, i32) {
    %c0_i32 = arith.constant 0 : i32
    %c0_i32_0 = arith.constant 0 : i32
    return %arg0, %c0_i32 : i32, i32
  }
}

</mosaic_0001>

<bundles_post_ra>
// kernel: feedforward_nn.1
= control target key start
LH: loop header
LB: loop body
LE: loop exit
PB: predicated region body
PF: predicated region fallthrough
CT: control target
= control target key end

     0   :  { %vm88_vm0 = vcmask 261120   ;;  %s3341_s0 = inlined_call_operand.vmem [shape: f32[8,32], index: 0, kind: input, shape index: {}]   ;;  %s3342_s1 = inlined_call_operand.vmem [shape: bf16[32,512], index: 1, kind: input, shape index: {}]   ;;  %s3343_s2 = inlined_call_operand.vmem [shape: f32[1,512], index: 2, kind: input, shape index: {}]   ;;  %s3344_s3 = inlined_call_operand.vmem [shape: bf16[512,512], index: 3, kind: input, shape index: {}]   ;;  %s3345_s4 = inlined_call_operand.vmem [shape: f32[1,512], index: 4, kind: input, shape index: {}]   ;;  %s3346_s5 = inlined_call_operand.vmem [shape: bf16[512,128], index: 5, kind: input, shape index: {}]   ;;  %s3347_s6 = inlined_call_operand.vmem [shape: f32[1,128], index: 6, kind: input, shape index: {}]   ;;  %s3348_s7 = inlined_call_operand.hbm [shape: f32[8,128], index: 7, kind: output, shape index: {}]  }
   0x1   :  { %v1485_v0 = vld [vmem:[%s3342_s1 + $0x20] sm:$0xf]  ;;  %v2149_v1 = vld [vmem:[%s3342_s1 + $0x2c] sm:$0xf0]  ;;  %v2147_v2 = vld [vmem:[%s3342_s1 + $0x24] sm:$0xf] }
   0x2   :  { %v1486_v3 = vor.u32 %v2149_v1, %v1485_v0  ;;  %v1487_v4 = vld [vmem:[%s3342_s1 + $0x30] sm:$0xf0]  ;;  %v1493_v5 = vld [vmem:[%s3342_s1 + $0x28] sm:$0xf]  ;;  %v2150_v6 = vld [vmem:[%s3342_s1 + $0x34] sm:$0xf0] }
   0x3   :  { %v1490_v7 = vor.u32 %v2147_v2, %v1487_v4  ;;  %v1494_v8 = vor.u32 %v2150_v6, %v1493_v5  ;;  %v2148_v9 = vld [vmem:[%s3342_s1 + $0x2c] sm:$0xf]  ;;  %v1495_v10 = vld [vmem:[%s3342_s1 + $0x38] sm:$0xf0]  ;;  %v1469_v11 = vld [vmem:[%s3342_s1] sm:$0xf] }
   0x4   :  { %98 = vmatpush.bf16.msra.mxu0 %v1486_v3  ;;  %v1498_v12 = vor.u32 %v2148_v9, %v1495_v10  ;;  %v2145_v13 = vld [vmem:[%s3342_s1 + $0xc] sm:$0xf0]  ;;  %v2143_v14 = vld [vmem:[%s3342_s1 + $0x4] sm:$0xf]  ;;  %v1471_v15 = vld [vmem:[%s3342_s1 + $0x10] sm:$0xf0] }
   0x5   :  { %111 = vmatpush.bf16.msra.mxu1 %v1490_v7  ;;  %124 = vmatpush.bf16.msra.mxu2 %v1494_v8  ;;  %v1470_v16 = vor.u32 %v2145_v13, %v1469_v11  ;;  %v1474_v17 = vor.u32 %v2143_v14, %v1471_v15  ;;  %v1477_v18 = vld [vmem:[%s3342_s1 + $0x8] sm:$0xf]  ;;  %v2146_v19 = vld [vmem:[%s3342_s1 + $0x14] sm:$0xf0]  ;;  %v2144_v20 = vld [vmem:[%s3342_s1 + $0xc] sm:$0xf] }
   0x6   :  { %137 = vmatpush.bf16.msra.mxu3 %v1498_v12  ;;  %v1478_v21 = vor.u32 %v2146_v19, %v1477_v18  ;;  %v1479_v22 = vld [vmem:[%s3342_s1 + $0x18] sm:$0xf0]  ;;  %v28_v23 = vld [vmem:[%s3341_s0] sm:$0xff]  ;;  %v2181_v27 = vld [vmem:[%s3344_s3 + $0xec] sm:$0xf0] }
   0x7   :  { %v1617_v24 = vld [vmem:[%s3344_s3 + $0xe0] sm:$0xf]  ;;  %v1482_v25 = vor.u32 %v2144_v20, %v1479_v22  ;;  %v29_v26 = vpack.c.bf16 %v28_v23, %v28_v23  ;;  %v2213_v29 = vld [vmem:[%s3344_s3 + $0x1ec] sm:$0xf0] }
   0x8   :  { %v1745_v28 = vld [vmem:[%s3344_s3 + $0x1e0] sm:$0xf]  ;;  %99 = vmatpush.bf16.msra.mxu0 %v1470_v16  ;;  %v1618_v30 = vor.u32 %v2181_v27, %v1617_v24  ;;  %v2177_v33 = vld [vmem:[%s3344_s3 + $0xcc] sm:$0xf0] }
   0x9   :  { %v1746_v31 = vor.u32 %v2213_v29, %v1745_v28  ;;  %v1601_v32 = vld [vmem:[%s3344_s3 + $0xc0] sm:$0xf]  ;;  %112 = vmatpush.bf16.msra.mxu1 %v1474_v17  ;;  %125 = vmatpush.bf16.msra.mxu2 %v1478_v21  ;;  %v2209_v35 = vld [vmem:[%s3344_s3 + $0x1cc] sm:$0xf0] }
   0xa   :  { %v1729_v34 = vld [vmem:[%s3344_s3 + $0x1c0] sm:$0xf]  ;;  %v2245_v37 = vld [vmem:[%s3344_s3 + $0x2ec] sm:$0xf0]  ;;  %138 = vmatpush.bf16.msra.mxu3 %v1482_v25  ;;  %v1602_v38 = vor.u32 %v2177_v33, %v1601_v32 }
   0xb   :  { %v1873_v36 = vld [vmem:[%s3344_s3 + $0x2e0] sm:$0xf]  ;;  %v2277_v41 = vld [vmem:[%s3344_s3 + $0x3ec] sm:$0xf0]  ;;  %1499 = vmatmul.msk.bf16.vlgmr.msra.gmra.mxu0 %vm88_vm0, %v29_v26  ;;  %v1730_v43 = vor.u32 %v2209_v35, %v1729_v34 }
   0xc   :  { %926 = vmatpush.bf16.msrb.mxu0 %v1618_v30  ;;  %v1874_v39 = vor.u32 %v2245_v37, %v1873_v36  ;;  %v2001_v40 = vld [vmem:[%s3344_s3 + $0x3e0] sm:$0xf]  ;;  %v2173_v45 = vld [vmem:[%s3344_s3 + $0xac] sm:$0xf0]  ;;  %1500 = vmatmul.msk.bf16.vlgmr.msra.gmra.mxu1 %vm88_vm0, %v29_v26 }
   0xd   :  { %v1585_v42 = vld [vmem:[%s3344_s3 + $0xa0] sm:$0xf]  ;;  %939 = vmatpush.bf16.msrb.mxu1 %v1746_v31  ;;  %v2002_v44 = vor.u32 %v2277_v41, %v2001_v40  ;;  %v2205_v47 = vld [vmem:[%s3344_s3 + $0x1ac] sm:$0xf0]  ;;  %1501 = vmatmul.msk.bf16.vlgmr.msra.gmra.mxu2 %vm88_vm0, %v29_v26 }
   0xe   :  { %v1713_v46 = vld [vmem:[%s3344_s3 + $0x1a0] sm:$0xf]  ;;  %v2241_v49 = vld [vmem:[%s3344_s3 + $0x2cc] sm:$0xf0]  ;;  %1502 = vmatmul.msk.bf16.vlgmr.msra.gmra.mxu3 %vm88_vm0, %v29_v26  ;;  %952 = vmatpush.bf16.msrb.mxu2 %v1874_v39  ;;  %v1586_v53 = vor.u32 %v2173_v45, %v1585_v42 }
   0xf   :  { %v1857_v48 = vld [vmem:[%s3344_s3 + $0x2c0] sm:$0xf]  ;;  %v2273_v52 = vld [vmem:[%s3344_s3 + $0x3cc] sm:$0xf0]  ;;  %965 = vmatpush.bf16.msrb.mxu3 %v2002_v44  ;;  %v1714_v58 = vor.u32 %v2205_v47, %v1713_v46 }
  0x10   :  { %v1985_v50 = vld [vmem:[%s3344_s3 + $0x3c0] sm:$0xf]  ;;  %v1858_v51 = vor.u32 %v2241_v49, %v1857_v48  ;;  %927 = vmatpush.bf16.msrb.mxu0 %v1602_v38  ;;  %v2169_v56 = vld [vmem:[%s3344_s3 + $0x8c] sm:$0xf0]  ;;  %v2179_v48 = vld [vmem:[%s3344_s3 + $0xe4] sm:$0xf] }
  0x11   :  { %v1986_v54 = vor.u32 %v2273_v52, %v1985_v50  ;;  %v1569_v55 = vld [vmem:[%s3344_s3 + $0x80] sm:$0xf]  ;;  %940 = vmatpush.bf16.msrb.mxu1 %v1730_v43  ;;  %v2237_v59 = vld [vmem:[%s3344_s3 + $0x2ac] sm:$0xf0]  ;;  %v1619_v49 = vld [vmem:[%s3344_s3 + $0xf0] sm:$0xf0] }
  0x12   :  { %v1841_v57 = vld [vmem:[%s3344_s3 + $0x2a0] sm:$0xf]  ;;  %v2269_v61 = vld [vmem:[%s3344_s3 + $0x3ac] sm:$0xf0]  ;;  %953 = vmatpush.bf16.msrb.mxu2 %v1858_v51  ;;  %v1570_v1 = vor.u32 %v2169_v56, %v1569_v55  ;;  %v2211_v50 = vld [vmem:[%s3344_s3 + $0x1e4] sm:$0xf] }
  0x13   :  { %v1969_v60 = vld [vmem:[%s3344_s3 + $0x3a0] sm:$0xf]  ;;  %v2201_v63 = vld [vmem:[%s3344_s3 + $0x18c] sm:$0xf0]  ;;  %v1842_v0 = vor.u32 %v2237_v59, %v1841_v57  ;;  %966 = vmatpush.bf16.msrb.mxu3 %v1986_v54  ;;  %v1747_v51 = vld [vmem:[%s3344_s3 + $0x1f0] sm:$0xf0] }
  0x14   :  { %v1697_v62 = vld [vmem:[%s3344_s3 + $0x180] sm:$0xf]  ;;  %928 = vmatpush.bf16.msrb.mxu0 %v1586_v53  ;;  %v1970_v2 = vor.u32 %v2269_v61, %v1969_v60  ;;  %v2233_v5 = vld [vmem:[%s3344_s3 + $0x28c] sm:$0xf0]  ;;  %v2175_v55 = vld [vmem:[%s3344_s3 + $0xc4] sm:$0xf]  ;;  %v1622_v60 = vor.u32 %v2179_v48, %v1619_v49 }
  0x15   :  { %v1553_v3 = vld [vmem:[%s3344_s3 + $0x60] sm:$0xf]  ;;  %941 = vmatpush.bf16.msrb.mxu1 %v1714_v58  ;;  %v1698_v6 = vor.u32 %v2201_v63, %v1697_v62  ;;  %v2165_v7 = vld [vmem:[%s3344_s3 + $0x6c] sm:$0xf0]  ;;  %v2243_v62 = vld [vmem:[%s3344_s3 + $0x2e4] sm:$0xf] }
  0x16   :  { %v1825_v4 = vld [vmem:[%s3344_s3 + $0x280] sm:$0xf]  ;;  %v2265_v9 = vld [vmem:[%s3344_s3 + $0x38c] sm:$0xf0]  ;;  %954 = vmatpush.bf16.msrb.mxu2 %v1842_v0  ;;  %v1554_v13 = vor.u32 %v2165_v7, %v1553_v3  ;;  %v1875_v63 = vld [vmem:[%s3344_s3 + $0x2f0] sm:$0xf0]  ;;  %v1750_v0 = vor.u32 %v2211_v50, %v1747_v51 }
  0x17   :  { %v1953_v8 = vld [vmem:[%s3344_s3 + $0x380] sm:$0xf]  ;;  %v2197_v11 = vld [vmem:[%s3344_s3 + $0x16c] sm:$0xf0]  ;;  %v1826_v12 = vor.u32 %v2233_v5, %v1825_v4  ;;  %967 = vmatpush.bf16.msrb.mxu3 %v1970_v2  ;;  %v2275_v2 = vld [vmem:[%s3344_s3 + $0x3e4] sm:$0xf] }
  0x18   :  { %v1681_v10 = vld [vmem:[%s3344_s3 + $0x160] sm:$0xf]  ;;  %929 = vmatpush.bf16.msrb.mxu0 %v1570_v1  ;;  %v1954_v14 = vor.u32 %v2265_v9, %v1953_v8  ;;  %v2229_v17 = vld [vmem:[%s3344_s3 + $0x26c] sm:$0xf0]  ;;  %v1603_v1 = vld [vmem:[%s3344_s3 + $0xd0] sm:$0xf0]  ;;  %v1878_v8 = vor.u32 %v2243_v62, %v1875_v63 }
  0x19   :  { %v1537_v15 = vld [vmem:[%s3344_s3 + $0x40] sm:$0xf]  ;;  %942 = vmatpush.bf16.msrb.mxu1 %v1698_v6  ;;  %v1682_v18 = vor.u32 %v2197_v11, %v1681_v10  ;;  %v2161_v19 = vld [vmem:[%s3344_s3 + $0x4c] sm:$0xf0]  ;;  %v2003_v3 = vld [vmem:[%s3344_s3 + $0x3f0] sm:$0xf0]  ;;  %v1606_v9 = vor.u32 %v2175_v55, %v1603_v1 }
  0x1a   :  { %v1809_v16 = vld [vmem:[%s3344_s3 + $0x260] sm:$0xf]  ;;  %v2261_v21 = vld [vmem:[%s3344_s3 + $0x36c] sm:$0xf0]  ;;  %955 = vmatpush.bf16.msrb.mxu2 %v1826_v12  ;;  %v1538_v25 = vor.u32 %v2161_v19, %v1537_v15  ;;  %v2207_v4 = vld [vmem:[%s3344_s3 + $0x1c4] sm:$0xf]  ;;  %v2006_v10 = vor.u32 %v2275_v2, %v2003_v3 }
  0x1b   :  { %v1937_v20 = vld [vmem:[%s3344_s3 + $0x360] sm:$0xf]  ;;  %v2193_v23 = vld [vmem:[%s3344_s3 + $0x14c] sm:$0xf0]  ;;  %v1810_v24 = vor.u32 %v2229_v17, %v1809_v16  ;;  %968 = vmatpush.bf16.msrb.mxu3 %v1954_v14  ;;  %v1731_v5 = vld [vmem:[%s3344_s3 + $0x1d0] sm:$0xf0] }
  0x1c   :  { %v1665_v22 = vld [vmem:[%s3344_s3 + $0x140] sm:$0xf]  ;;  %930 = vmatpush.bf16.msrb.mxu0 %v1554_v13  ;;  %v1938_v26 = vor.u32 %v2261_v21, %v1937_v20  ;;  %v2225_v29 = vld [vmem:[%s3344_s3 + $0x24c] sm:$0xf0]  ;;  %v2171_v11 = vld [vmem:[%s3344_s3 + $0xa4] sm:$0xf]  ;;  %v1734_v14 = vor.u32 %v2207_v4, %v1731_v5 }
  0x1d   :  { %v1521_v27 = vld [vmem:[%s3344_s3 + $0x20] sm:$0xf]  ;;  %943 = vmatpush.bf16.msrb.mxu1 %v1682_v18  ;;  %v1666_v30 = vor.u32 %v2193_v23, %v1665_v22  ;;  %v2157_v31 = vld [vmem:[%s3344_s3 + $0x2c] sm:$0xf0]  ;;  %v2239_v12 = vld [vmem:[%s3344_s3 + $0x2c4] sm:$0xf] }
  0x1e   :  { %v1793_v28 = vld [vmem:[%s3344_s3 + $0x240] sm:$0xf]  ;;  %v2257_v33 = vld [vmem:[%s3344_s3 + $0x34c] sm:$0xf0]  ;;  %956 = vmatpush.bf16.msrb.mxu2 %v1810_v24  ;;  %v1522_v38 = vor.u32 %v2157_v31, %v1521_v27  ;;  %v1859_v13 = vld [vmem:[%s3344_s3 + $0x2d0] sm:$0xf0] }
  0x1f   :  { %v1921_v32 = vld [vmem:[%s3344_s3 + $0x340] sm:$0xf]  ;;  %v2189_v35 = vld [vmem:[%s3344_s3 + $0x12c] sm:$0xf0]  ;;  %v1794_v36 = vor.u32 %v2225_v29, %v1793_v28  ;;  %969 = vmatpush.bf16.msrb.mxu3 %v1938_v26  ;;  %v1587_v15 = vld [vmem:[%s3344_s3 + $0xb0] sm:$0xf0]  ;;  %v1862_v20 = vor.u32 %v2239_v12, %v1859_v13 }
  0x20   :  { %v1649_v34 = vld [vmem:[%s3344_s3 + $0x120] sm:$0xf]  ;;  %931 = vmatpush.bf16.msrb.mxu0 %v1538_v25  ;;  %v1922_v39 = vor.u32 %v2257_v33, %v1921_v32  ;;  %v2153_v40 = vld [vmem:[%s3344_s3 + $0xc] sm:$0xf0]  ;;  %v2271_v16 = vld [vmem:[%s3344_s3 + $0x3c4] sm:$0xf]  ;;  %v1590_v23 = vor.u32 %v2171_v11, %v1587_v15 }
  0x21   :  { %v1505_v37 = vld [vmem:[%s3344_s3] sm:$0xf]  ;;  %v2221_v42 = vld [vmem:[%s3344_s3 + $0x22c] sm:$0xf0]  ;;  %944 = vmatpush.bf16.msrb.mxu1 %v1666_v30  ;;  %v1650_v43 = vor.u32 %v2189_v35, %v1649_v34  ;;  %v1987_v17 = vld [vmem:[%s3344_s3 + $0x3d0] sm:$0xf0] }
  0x22   :  { %v1777_v41 = vld [vmem:[%s3344_s3 + $0x220] sm:$0xf]  ;;  %v2253_v46 = vld [vmem:[%s3344_s3 + $0x32c] sm:$0xf0]  ;;  %957 = vmatpush.bf16.msrb.mxu2 %v1794_v36  ;;  %v1506_v53 = vor.u32 %v2153_v40, %v1505_v37  ;;  %v2203_v18 = vld [vmem:[%s3344_s3 + $0x1a4] sm:$0xf]  ;;  %v1990_v24 = vor.u32 %v2271_v16, %v1987_v17 }
  0x23   :  { %v1633_v44 = vld [vmem:[%s3344_s3 + $0x100] sm:$0xf]  ;;  %v2185_v47 = vld [vmem:[%s3344_s3 + $0x10c] sm:$0xf0]  ;;  %v1778_v52 = vor.u32 %v2221_v42, %v1777_v41  ;;  %970 = vmatpush.bf16.msrb.mxu3 %v1922_v39  ;;  %v1715_v19 = vld [vmem:[%s3344_s3 + $0x1b0] sm:$0xf0] }
  0x24   :  { %v1905_v45 = vld [vmem:[%s3344_s3 + $0x320] sm:$0xf]  ;;  %932 = vmatpush.bf16.msrb.mxu0 %v1522_v38  ;;  %v2217_v57 = vld [vmem:[%s3344_s3 + $0x20c] sm:$0xf0]  ;;  %v1634_v59 = vor.u32 %v2185_v47, %v1633_v44  ;;  %v2167_v21 = vld [vmem:[%s3344_s3 + $0x84] sm:$0xf] }
  0x25   :  { %v1906_v54 = vor.u32 %v2253_v46, %v1905_v45  ;;  %v1761_v56 = vld [vmem:[%s3344_s3 + $0x200] sm:$0xf]  ;;  %945 = vmatpush.bf16.msrb.mxu1 %v1650_v43  ;;  %v2249_v61 = vld [vmem:[%s3344_s3 + $0x30c] sm:$0xf0]  ;;  %v2235_v22 = vld [vmem:[%s3344_s3 + $0x2a4] sm:$0xf] }
  0x26   :  { %v1889_v58 = vld [vmem:[%s3344_s3 + $0x300] sm:$0xf]  ;;  %958 = vmatpush.bf16.msrb.mxu2 %v1778_v52  ;;  %v1762_v6 = vor.u32 %v2217_v57, %v1761_v56  ;;  %v1843_v25 = vld [vmem:[%s3344_s3 + $0x2b0] sm:$0xf0] }
  0x27   :  { %971 = vmatpush.bf16.msrb.mxu3 %v1906_v54  ;;  %v1890_v7 = vor.u32 %v2249_v61, %v1889_v58 }
  0x28   :  { %933 = vmatpush.bf16.msrb.mxu0 %v1506_v53 }
  0x29   :  { %946 = vmatpush.bf16.msrb.mxu1 %v1634_v59 }
  0x2a   :  { %959 = vmatpush.bf16.msrb.mxu2 %v1762_v6 }
  0x2b   :  { %972 = vmatpush.bf16.msrb.mxu3 %v1890_v7 }
  0x2c   :  { %978 = vmatpush.bf16.msra.mxu0 %v1622_v60 }
  0x2d   :  { %991 = vmatpush.bf16.msra.mxu1 %v1750_v0 }
  0x2e   :  { %1004 = vmatpush.bf16.msra.mxu2 %v1878_v8 }
  0x2f   :  { %1017 = vmatpush.bf16.msra.mxu3 %v2006_v10 }
  0x30   :  { %979 = vmatpush.bf16.msra.mxu0 %v1606_v9 }
  0x31   :  { %12 = vsyncpa [#allocation3], 0  ;;  %992 = vmatpush.bf16.msra.mxu1 %v1734_v14  ;;  %v1718_v26 = vor.u32 %v2203_v18, %v1715_v19  ;;  %v1571_v27 = vld [vmem:[%s3344_s3 + $0x90] sm:$0xf0]  ;;  %v2267_v28 = vld [vmem:[%s3344_s3 + $0x3a4] sm:$0xf]  ;;  %v1846_v32 = vor.u32 %v2235_v22, %v1843_v25 }
  0x32   :  { %v1971_v29 = vld [vmem:[%s3344_s3 + $0x3b0] sm:$0xf0]  ;;  %v2199_v30 = vld [vmem:[%s3344_s3 + $0x184] sm:$0xf]  ;;  %1005 = vmatpush.bf16.msra.mxu2 %v1862_v20  ;;  %v1574_v33 = vor.u32 %v2167_v21, %v1571_v27  ;;  %s2339_s25 = smov [#allocation2]   ;;  %s1458_s28 = sshll.u32 %s3348_s7, 4  ;;  %s1459_s28 = int_to_ptr.hbm [resolvable:$true] %s1458_s28 }
  0x33   :  { %v1699_v31 = vld [vmem:[%s3344_s3 + $0x190] sm:$0xf0]  ;;  %1018 = vmatpush.bf16.msra.mxu3 %v1990_v24  ;;  %v1974_v34 = vor.u32 %v2267_v28, %v1971_v29  ;;  %v2163_v35 = vld [vmem:[%s3344_s3 + $0x64] sm:$0xf]  ;;  %v1625_v29 = vld [vmem:[%s3344_s3 + $0xe8] sm:$0xf] }
  0x34   :  { %980 = vmatpush.bf16.msra.mxu0 %v1590_v23  ;;  %v2231_v36 = vld [vmem:[%s3344_s3 + $0x284] sm:$0xf]  ;;  %v1827_v37 = vld [vmem:[%s3344_s3 + $0x290] sm:$0xf0]  ;;  %v1702_v38 = vor.u32 %v2199_v30, %v1699_v31  ;;  %v2182_v30 = vld [vmem:[%s3344_s3 + $0xf4] sm:$0xf0] }
  0x35   :  { %993 = vmatpush.bf16.msra.mxu1 %v1718_v26  ;;  %v1555_v39 = vld [vmem:[%s3344_s3 + $0x70] sm:$0xf0]  ;;  %v2263_v40 = vld [vmem:[%s3344_s3 + $0x384] sm:$0xf]  ;;  %v1830_v44 = vor.u32 %v2231_v36, %v1827_v37  ;;  %v38_v26 = vld [vmem:[%s3343_s2] sm:$0xf]  ;;  %v1626_v37 = vor.u32 %v2182_v30, %v1625_v29 }
  0x36   :  { %v1955_v41 = vld [vmem:[%s3344_s3 + $0x390] sm:$0xf0]  ;;  %v2195_v42 = vld [vmem:[%s3344_s3 + $0x164] sm:$0xf]  ;;  %1006 = vmatpush.bf16.msra.mxu2 %v1846_v32  ;;  %v1558_v45 = vor.u32 %v2163_v35, %v1555_v39  ;;  %v40_v27 = vperm.slane %v38_v26, 0  ;;  %v41_v28 = vperm.slane %v38_v26, 1 }
  0x37   :  { %v1683_v43 = vld [vmem:[%s3344_s3 + $0x170] sm:$0xf0]  ;;  %1019 = vmatpush.bf16.msra.mxu3 %v1974_v34  ;;  %v1958_v46 = vor.u32 %v2263_v40, %v1955_v41  ;;  %v2159_v47 = vld [vmem:[%s3344_s3 + $0x44] sm:$0xf]  ;;  %v1753_v32 = vld [vmem:[%s3344_s3 + $0x1e8] sm:$0xf] }
  0x38   :  { %981 = vmatpush.bf16.msra.mxu0 %v1574_v33  ;;  %v2227_v48 = vld [vmem:[%s3344_s3 + $0x264] sm:$0xf]  ;;  %v1811_v49 = vld [vmem:[%s3344_s3 + $0x270] sm:$0xf0]  ;;  %v1686_v50 = vor.u32 %v2195_v42, %v1683_v43  ;;  %v2214_v33 = vld [vmem:[%s3344_s3 + $0x1f4] sm:$0xf0] }
  0x39   :  { %994 = vmatpush.bf16.msra.mxu1 %v1702_v38  ;;  %v1539_v51 = vld [vmem:[%s3344_s3 + $0x50] sm:$0xf0]  ;;  %v2259_v52 = vld [vmem:[%s3344_s3 + $0x364] sm:$0xf]  ;;  %v1814_v56 = vor.u32 %v2227_v48, %v1811_v49  ;;  %v1754_v39 = vor.u32 %v2214_v33, %v1753_v32  ;;  %v1609_v40 = vld [vmem:[%s3344_s3 + $0xc8] sm:$0xf] }
  0x3a   :  { %v1939_v53 = vld [vmem:[%s3344_s3 + $0x370] sm:$0xf0]  ;;  %v2191_v54 = vld [vmem:[%s3344_s3 + $0x144] sm:$0xf]  ;;  %1007 = vmatpush.bf16.msra.mxu2 %v1830_v44  ;;  %v1542_v57 = vor.u32 %v2159_v47, %v1539_v51  ;;  %v2178_v41 = vld [vmem:[%s3344_s3 + $0xd4] sm:$0xf0] }
  0x3b   :  { %v1667_v55 = vld [vmem:[%s3344_s3 + $0x150] sm:$0xf0]  ;;  %1020 = vmatpush.bf16.msra.mxu3 %v1958_v46  ;;  %v1942_v58 = vor.u32 %v2259_v52, %v1939_v53  ;;  %v2155_v60 = vld [vmem:[%s3344_s3 + $0x24] sm:$0xf]  ;;  %v42_v43 = vperm.slane %v38_v26, 2  ;;  %v43_v46 = vperm.slane %v38_v26, 3  ;;  %v1610_v47 = vor.u32 %v2178_v41, %v1609_v40 }
  0x3c   :  { %982 = vmatpush.bf16.msra.mxu0 %v1558_v45  ;;  %v1670_v59 = vor.u32 %v2191_v54, %v1667_v55  ;;  %v1523_v61 = vld [vmem:[%s3344_s3 + $0x30] sm:$0xf0]  ;;  %v2187_v62 = vld [vmem:[%s3344_s3 + $0x124] sm:$0xf]  ;;  %v1737_v44 = vld [vmem:[%s3344_s3 + $0x1c8] sm:$0xf] }
  0x3d   :  { %995 = vmatpush.bf16.msra.mxu1 %v1686_v50  ;;  %v1526_v63 = vor.u32 %v2155_v60, %v1523_v61  ;;  %v1651_v0 = vld [vmem:[%s3344_s3 + $0x130] sm:$0xf0]  ;;  %v2223_v2 = vld [vmem:[%s3344_s3 + $0x244] sm:$0xf]  ;;  %v2210_v45 = vld [vmem:[%s3344_s3 + $0x1d4] sm:$0xf0] }
  0x3e   :  { %1008 = vmatpush.bf16.msra.mxu2 %v1814_v56  ;;  %v1654_v1 = vor.u32 %v2187_v62, %v1651_v0  ;;  %v1795_v3 = vld [vmem:[%s3344_s3 + $0x250] sm:$0xf0]  ;;  %v2255_v5 = vld [vmem:[%s3344_s3 + $0x344] sm:$0xf]  ;;  %v1881_v48 = vld [vmem:[%s3344_s3 + $0x2e8] sm:$0xf]  ;;  %v1738_v52 = vor.u32 %v2210_v45, %v1737_v44 }
  0x3f   :  { %1021 = vmatpush.bf16.msra.mxu3 %v1942_v58  ;;  %v1798_v4 = vor.u32 %v2223_v2, %v1795_v3  ;;  %v1923_v6 = vld [vmem:[%s3344_s3 + $0x350] sm:$0xf0]  ;;  %v2151_v8 = vld [vmem:[%s3344_s3 + $0x4] sm:$0xf]  ;;  %v2246_v49 = vld [vmem:[%s3344_s3 + $0x2f4] sm:$0xf0] }
  0x40   :  { %983 = vmatpush.bf16.msra.mxu0 %v1542_v57  ;;  %v1926_v7 = vor.u32 %v2255_v5, %v1923_v6  ;;  %v1507_v9 = vld [vmem:[%s3344_s3 + $0x10] sm:$0xf0]  ;;  %v2183_v10 = vld [vmem:[%s3344_s3 + $0x104] sm:$0xf]  ;;  %v2009_v50 = vld [vmem:[%s3344_s3 + $0x3e8] sm:$0xf] }
  0x41   :  { %996 = vmatpush.bf16.msra.mxu1 %v1670_v59  ;;  %v1510_v11 = vor.u32 %v2151_v8, %v1507_v9  ;;  %v1635_v12 = vld [vmem:[%s3344_s3 + $0x110] sm:$0xf0]  ;;  %v2219_v14 = vld [vmem:[%s3344_s3 + $0x224] sm:$0xf]  ;;  %v2278_v53 = vld [vmem:[%s3344_s3 + $0x3f4] sm:$0xf0] }
  0x42   :  { %1009 = vmatpush.bf16.msra.mxu2 %v1798_v4  ;;  %v1638_v13 = vor.u32 %v2183_v10, %v1635_v12  ;;  %v1779_v15 = vld [vmem:[%s3344_s3 + $0x230] sm:$0xf0]  ;;  %v2251_v16 = vld [vmem:[%s3344_s3 + $0x324] sm:$0xf]  ;;  %v1593_v54 = vld [vmem:[%s3344_s3 + $0xa8] sm:$0xf] }
  0x43   :  { %1022 = vmatpush.bf16.msra.mxu3 %v1926_v7  ;;  %v1907_v17 = vld [vmem:[%s3344_s3 + $0x330] sm:$0xf0]  ;;  %v1782_v18 = vor.u32 %v2219_v14, %v1779_v15  ;;  %v2215_v20 = vld [vmem:[%s3344_s3 + $0x204] sm:$0xf]  ;;  %v2174_v55 = vld [vmem:[%s3344_s3 + $0xb4] sm:$0xf0] }
  0x44   :  { %984 = vmatpush.bf16.msra.mxu0 %v1526_v63  ;;  %v1910_v19 = vor.u32 %v2251_v16, %v1907_v17  ;;  %v1763_v21 = vld [vmem:[%s3344_s3 + $0x210] sm:$0xf0]  ;;  %v2247_v23 = vld [vmem:[%s3344_s3 + $0x304] sm:$0xf]  ;;  %v1721_v59 = vld [vmem:[%s3344_s3 + $0x1a8] sm:$0xf]  ;;  %v1882_v63 = vor.u32 %v2246_v49, %v1881_v48  ;;  %v1594_v2 = vor.u32 %v2174_v55, %v1593_v54 }
  0x45   :  { %997 = vmatpush.bf16.msra.mxu1 %v1654_v1  ;;  %v1766_v22 = vor.u32 %v2215_v20, %v1763_v21  ;;  %v1891_v24 = vld [vmem:[%s3344_s3 + $0x310] sm:$0xf0]  ;;  %v2206_v60 = vld [vmem:[%s3344_s3 + $0x1b4] sm:$0xf0]  ;;  %v2010_v1 = vor.u32 %v2278_v53, %v2009_v50  ;;  %v1865_v3 = vld [vmem:[%s3344_s3 + $0x2c8] sm:$0xf] }
  0x46   :  { %1010 = vmatpush.bf16.msra.mxu2 %v1782_v18  ;;  %v1894_v25 = vor.u32 %v2247_v23, %v1891_v24  ;;  %v2242_v4 = vld [vmem:[%s3344_s3 + $0x2d4] sm:$0xf0]  ;;  %v1993_v5 = vld [vmem:[%s3344_s3 + $0x3c8] sm:$0xf]  ;;  %v1722_v7 = vor.u32 %v2206_v60, %v1721_v59  ;;  %s1456_s2 = sshll.u32 %s2339_s25, 4  ;;  %s1457_s2 = int_to_ptr.vmem [resolvable:$true] %s1456_s2 }
  0x47   :  { %1023 = vmatpush.bf16.msra.mxu3 %v1910_v19  ;;  %v2274_v8 = vld [vmem:[%s3344_s3 + $0x3d4] sm:$0xf0]  ;;  %v1577_v9 = vld [vmem:[%s3344_s3 + $0x88] sm:$0xf] }
  0x48   :  { %985 = vmatpush.bf16.msra.mxu0 %v1510_v11  ;;  %v2170_v10 = vld [vmem:[%s3344_s3 + $0x94] sm:$0xf0]  ;;  %v1705_v11 = vld [vmem:[%s3344_s3 + $0x188] sm:$0xf]  ;;  %v1994_v14 = vor.u32 %v2274_v8, %v1993_v5  ;;  %v2212_v5 = vld [vmem:[%s3344_s3 + $0x1ec] sm:$0xf] }
  0x49   :  { %998 = vmatpush.bf16.msra.mxu1 %v1638_v13  ;;  %v2202_v12 = vld [vmem:[%s3344_s3 + $0x194] sm:$0xf0]  ;;  %v1866_v13 = vor.u32 %v2242_v4, %v1865_v3  ;;  %v1578_v15 = vor.u32 %v2170_v10, %v1577_v9  ;;  %v1849_v16 = vld [vmem:[%s3344_s3 + $0x2a8] sm:$0xf]  ;;  %v1627_v4 = vld [vmem:[%s3344_s3 + $0xf8] sm:$0xf0] }
  0x4a   :  { %1011 = vmatpush.bf16.msra.mxu2 %v1766_v22  ;;  %v2238_v17 = vld [vmem:[%s3344_s3 + $0x2b4] sm:$0xf0]  ;;  %v1706_v19 = vor.u32 %v2202_v12, %v1705_v11  ;;  %v1977_v20 = vld [vmem:[%s3344_s3 + $0x3a8] sm:$0xf] }
  0x4b   :  { %1024 = vmatpush.bf16.msra.mxu3 %v1894_v25  ;;  %v2270_v21 = vld [vmem:[%s3344_s3 + $0x3b4] sm:$0xf0]  ;;  %v1561_v22 = vld [vmem:[%s3344_s3 + $0x68] sm:$0xf] }
  0x4c   :  { %v2166_v24 = vld [vmem:[%s3344_s3 + $0x74] sm:$0xf0]  ;;  %v1689_v25 = vld [vmem:[%s3344_s3 + $0x168] sm:$0xf] }
  0x4d   :  { %v2198_v26 = vld [vmem:[%s3344_s3 + $0x174] sm:$0xf0]  ;;  %v1833_v29 = vld [vmem:[%s3344_s3 + $0x288] sm:$0xf] }
  0x4e   :  { %v2234_v30 = vld [vmem:[%s3344_s3 + $0x294] sm:$0xf0]  ;;  %v1690_v32 = vor.u32 %v2198_v26, %v1689_v25  ;;  %v1961_v33 = vld [vmem:[%s3344_s3 + $0x388] sm:$0xf] }
  0x4f   :  { %v1834_v40 = vor.u32 %v2234_v30, %v1833_v29  ;;  %v2230_v44 = vld [vmem:[%s3344_s3 + $0x274] sm:$0xf0]  ;;  %v1529_v49 = vld [vmem:[%s3344_s3 + $0x28] sm:$0xf] }
  0x50   :  { %v2262_v48 = vld [vmem:[%s3344_s3 + $0x374] sm:$0xf0]  ;;  %v1801_v55 = vld [vmem:[%s3344_s3 + $0x248] sm:$0xf] }
  0x51   :  { %v2158_v50 = vld [vmem:[%s3344_s3 + $0x34] sm:$0xf0]  ;;  %v1785_v9 = vld [vmem:[%s3344_s3 + $0x228] sm:$0xf] }
  0x52   :  { %v2258_v60 = vld [vmem:[%s3344_s3 + $0x354] sm:$0xf0]  ;;  %v1897_v25 = vld [vmem:[%s3344_s3 + $0x308] sm:$0xf] }
  0x53   :  { %v2222_v10 = vld [vmem:[%s3344_s3 + $0x234] sm:$0xf0] }
  0x54   :  { %v2250_v26 = vld [vmem:[%s3344_s3 + $0x314] sm:$0xf0] }
  0x88   :  { %v101_v31 = vpop.f32.mrf.mxu0 }
  0x89   :  { %v102_v34 = vadd.f32 %v101_v31, %v40_v27  ;;  %v114_v35 = vpop.f32.mrf.mxu1  ;;  %v1850_v27 = vor.u32 %v2238_v17, %v1849_v16  ;;  %v1562_v31 = vor.u32 %v2166_v24, %v1561_v22  ;;  %v2176_v17 = vld [vmem:[%s3344_s3 + $0xcc] sm:$0xf]  ;;  %v2218_v24 = vld [vmem:[%s3344_s3 + $0x214] sm:$0xf0] }
  0x8a   :  { %v115_v36 = vadd.f32 %v114_v35, %v41_v28  ;;  %v1978_v28 = vor.u32 %v2270_v21, %v1977_v20  ;;  %v1545_v35 = vld [vmem:[%s3344_s3 + $0x48] sm:$0xf]  ;;  %v2208_v20 = vld [vmem:[%s3344_s3 + $0x1cc] sm:$0xf]  ;;  %v1739_v21 = vld [vmem:[%s3344_s3 + $0x1d8] sm:$0xf0] }
  0x8b   :  { %v2834_v38 = vpack.c.bf16 %v102_v34, %v102_v34  ;;  %v2266_v34 = vld [vmem:[%s3344_s3 + $0x394] sm:$0xf0]  ;;  %v1742_v30 = vor.u32 %v2208_v20, %v1739_v21  ;;  %v2260_v21 = vld [vmem:[%s3344_s3 + $0x36c] sm:$0xf] }
  0x8c   :  { %v2842_v42 = vpack.c.bf16 %v115_v36, %v115_v36  ;;  %v2162_v36 = vld [vmem:[%s3344_s3 + $0x54] sm:$0xf0]  ;;  %v1962_v41 = vor.u32 %v2266_v34, %v1961_v33  ;;  %v2172_v33 = vld [vmem:[%s3344_s3 + $0xac] sm:$0xf] }
  0x8d   :  { %934 = vmatmul.bf16.vlgmr.msrb.gmra.mxu0 %v2834_v38  ;;  %v1546_v45 = vor.u32 %v2162_v36, %v1545_v35  ;;  %v1595_v35 = vld [vmem:[%s3344_s3 + $0xb8] sm:$0xf0]  ;;  %v2204_v36 = vld [vmem:[%s3344_s3 + $0x1ac] sm:$0xf] }
  0x8e   :  { %947 = vmatmul.bf16.vlgmr.msrb.gmra.mxu1 %v2842_v42  ;;  %1030 = vmatpush.bf16.msrb.mxu0 %v1626_v37  ;;  %v1673_v37 = vld [vmem:[%s3344_s3 + $0x148] sm:$0xf] }
  0x8f   :  { %1043 = vmatpush.bf16.msrb.mxu1 %v1754_v39  ;;  %v2194_v39 = vld [vmem:[%s3344_s3 + $0x154] sm:$0xf0] }
  0x90   :  { %v127_v51 = vpop.f32.mrf.mxu2  ;;  %v103_v58 = vpop.f32.mrf.mxu0 }
  0x91   :  { %v128_v56 = vadd.f32 %v127_v51, %v42_v43  ;;  %v140_v57 = vpop.f32.mrf.mxu3  ;;  %v116_v62 = vpop.f32.mrf.mxu1  ;;  %v1817_v43 = vld [vmem:[%s3344_s3 + $0x268] sm:$0xf]  ;;  %v1530_v58 = vor.u32 %v2158_v50, %v1529_v49  ;;  %v2168_v49 = vld [vmem:[%s3344_s3 + $0x8c] sm:$0xf]  ;;  %v1579_v50 = vld [vmem:[%s3344_s3 + $0x98] sm:$0xf0] }
  0x92   :  { %v141_v61 = vadd.f32 %v140_v57, %v43_v46  ;;  %1031 = vmatpush.bf16.msrb.mxu0 %v1610_v47  ;;  %v1674_v46 = vor.u32 %v2194_v39, %v1673_v37  ;;  %v1945_v47 = vld [vmem:[%s3344_s3 + $0x368] sm:$0xf]  ;;  %v1818_v53 = vor.u32 %v2230_v44, %v1817_v43  ;;  %v2154_v62 = vld [vmem:[%s3344_s3 + $0x14] sm:$0xf0]  ;;  %v1723_v37 = vld [vmem:[%s3344_s3 + $0x1b8] sm:$0xf0]  ;;  %v1898_v39 = vor.u32 %v2250_v26, %v1897_v25 }
  0x93   :  { %v2876_v0 = vpack.c.bf16 %v128_v56, %v128_v56  ;;  %1044 = vmatpush.bf16.msrb.mxu1 %v1738_v52  ;;  %v1657_v51 = vld [vmem:[%s3344_s3 + $0x128] sm:$0xf]  ;;  %v2190_v52 = vld [vmem:[%s3344_s3 + $0x134] sm:$0xf0]  ;;  %v1946_v54 = vor.u32 %v2262_v48, %v1945_v47  ;;  %v2240_v43 = vld [vmem:[%s3344_s3 + $0x2cc] sm:$0xf] }
  0x94   :  { %v2887_v6 = vpack.c.bf16 %v141_v61, %v141_v61  ;;  %v2226_v56 = vld [vmem:[%s3344_s3 + $0x254] sm:$0xf0]  ;;  %v1929_v57 = vld [vmem:[%s3344_s3 + $0x348] sm:$0xf]  ;;  %v1658_v59 = vor.u32 %v2190_v52, %v1657_v51  ;;  %v1867_v44 = vld [vmem:[%s3344_s3 + $0x2d8] sm:$0xf0] }
  0x95   :  { %960 = vmatmul.bf16.vlgmr.msrb.gmra.mxu2 %v2876_v0  ;;  %v1513_v61 = vld [vmem:[%s3344_s3 + $0x8] sm:$0xf]  ;;  %v1802_v3 = vor.u32 %v2226_v56, %v1801_v55  ;;  %v1930_v8 = vor.u32 %v2258_v60, %v1929_v57  ;;  %v2272_v47 = vld [vmem:[%s3344_s3 + $0x3cc] sm:$0xf]  ;;  %v1995_v48 = vld [vmem:[%s3344_s3 + $0x3d8] sm:$0xf0]  ;;  %v1582_v57 = vor.u32 %v2168_v49, %v1579_v50 }
  0x96   :  { %973 = vmatmul.bf16.vlgmr.msrb.gmra.mxu3 %v2887_v6  ;;  %1056 = vmatpush.bf16.msrb.mxu2 %v1882_v63  ;;  %v1641_v63 = vld [vmem:[%s3344_s3 + $0x108] sm:$0xf]  ;;  %v1514_v11 = vor.u32 %v2154_v62, %v1513_v61  ;;  %v2200_v51 = vld [vmem:[%s3344_s3 + $0x18c] sm:$0xf]  ;;  %v1707_v52 = vld [vmem:[%s3344_s3 + $0x198] sm:$0xf0] }
  0x97   :  { %1069 = vmatpush.bf16.msrb.mxu3 %v2010_v1  ;;  %1032 = vmatpush.bf16.msrb.mxu0 %v1594_v2  ;;  %v2186_v1 = vld [vmem:[%s3344_s3 + $0x114] sm:$0xf0]  ;;  %v2180_v2 = vld [vmem:[%s3344_s3 + $0xec] sm:$0xf]  ;;  %v1851_v56 = vld [vmem:[%s3344_s3 + $0x2b8] sm:$0xf0] }
  0x98   :  { %1045 = vmatpush.bf16.msrb.mxu1 %v1722_v7  ;;  %v129_v18 = vpop.f32.mrf.mxu2  ;;  %v1755_v7 = vld [vmem:[%s3344_s3 + $0x1f8] sm:$0xf0]  ;;  %v1642_v12 = vor.u32 %v2186_v1, %v1641_v63  ;;  %v2236_v55 = vld [vmem:[%s3344_s3 + $0x2ac] sm:$0xf] }
  0x99   :  { %v142_v23 = vpop.f32.mrf.mxu3  ;;  %v1758_v16 = vor.u32 %v2212_v5, %v1755_v7  ;;  %v1786_v18 = vor.u32 %v2222_v10, %v1785_v9  ;;  %v1979_v60 = vld [vmem:[%s3344_s3 + $0x3b8] sm:$0xf0]  ;;  %v2164_v61 = vld [vmem:[%s3344_s3 + $0x6c] sm:$0xf] }
  0x9a   :  { %1057 = vmatpush.bf16.msrb.mxu2 %v1866_v13  ;;  %v1913_v13 = vld [vmem:[%s3344_s3 + $0x328] sm:$0xf]  ;;  %v1563_v62 = vld [vmem:[%s3344_s3 + $0x78] sm:$0xf0]  ;;  %v2196_v63 = vld [vmem:[%s3344_s3 + $0x16c] sm:$0xf] }
  0x9b   :  { %1070 = vmatpush.bf16.msrb.mxu3 %v1994_v14  ;;  %1033 = vmatpush.bf16.msrb.mxu0 %v1578_v15  ;;  %v2254_v14 = vld [vmem:[%s3344_s3 + $0x334] sm:$0xf0]  ;;  %v1630_v15 = vor.u32 %v2180_v2, %v1627_v4  ;;  %v1769_v23 = vld [vmem:[%s3344_s3 + $0x208] sm:$0xf]  ;;  %v1691_v1 = vld [vmem:[%s3344_s3 + $0x178] sm:$0xf0]  ;;  %v1854_v2 = vor.u32 %v2236_v55, %v1851_v56  ;;  %v1566_v7 = vor.u32 %v2164_v61, %v1563_v62 }
  0x9c   :  { %1046 = vmatpush.bf16.msrb.mxu1 %v1706_v19  ;;  %v1611_v19 = vld [vmem:[%s3344_s3 + $0xd8] sm:$0xf0]  ;;  %v1914_v22 = vor.u32 %v2254_v14, %v1913_v13  ;;  %v1770_v34 = vor.u32 %v2218_v24, %v1769_v23  ;;  %v2232_v4 = vld [vmem:[%s3344_s3 + $0x28c] sm:$0xf]  ;;  %v2285_v56 = vld [vmem:[%s3346_s5 + $0x30] sm:$0xff] }
  0x9d   :  { %986 = vmatmul.bf16.vlgmr.msra.gmra.mxu0 %v2834_v38  ;;  %v1614_v29 = vor.u32 %v2176_v17, %v1611_v19  ;;  %v1835_v5 = vld [vmem:[%s3344_s3 + $0x298] sm:$0xf0]  ;;  %v2264_v9 = vld [vmem:[%s3344_s3 + $0x38c] sm:$0xf] }
  0x9e   :  { %1058 = vmatpush.bf16.msrb.mxu2 %v1850_v27  ;;  %999 = vmatmul.bf16.vlgmr.msra.gmra.mxu1 %v2842_v42  ;;  %v2244_v27 = vld [vmem:[%s3344_s3 + $0x2ec] sm:$0xf]  ;;  %v1963_v10 = vld [vmem:[%s3344_s3 + $0x398] sm:$0xf0] }
  0x9f   :  { %1071 = vmatpush.bf16.msrb.mxu3 %v1978_v28  ;;  %1034 = vmatpush.bf16.msrb.mxu0 %v1562_v31  ;;  %v1883_v28 = vld [vmem:[%s3344_s3 + $0x2f8] sm:$0xf0]  ;;  %v2276_v31 = vld [vmem:[%s3344_s3 + $0x3ec] sm:$0xf] }
  0xa0   :  { %1047 = vmatpush.bf16.msrb.mxu1 %v1690_v32  ;;  %v2011_v32 = vld [vmem:[%s3344_s3 + $0x3f8] sm:$0xf0]  ;;  %v2192_v13 = vld [vmem:[%s3344_s3 + $0x14c] sm:$0xf] }
  0xa1   :  { %v1675_v14 = vld [vmem:[%s3344_s3 + $0x158] sm:$0xf0]  ;;  %v2228_v17 = vld [vmem:[%s3344_s3 + $0x26c] sm:$0xf] }
  0xa2   :  { %1059 = vmatpush.bf16.msrb.mxu2 %v1834_v40  ;;  %v1886_v40 = vor.u32 %v2244_v27, %v1883_v28  ;;  %v1678_v20 = vor.u32 %v2192_v13, %v1675_v14  ;;  %v2156_v23 = vld [vmem:[%s3344_s3 + $0x2c] sm:$0xf]  ;;  %v1531_v24 = vld [vmem:[%s3344_s3 + $0x38] sm:$0xf0]  ;;  %v2299_v13 = vld [vmem:[%s3346_s5 + $0xa0] sm:$0xff] }
  0xa3   :  { %1072 = vmatpush.bf16.msrb.mxu3 %v1962_v41  ;;  %1035 = vmatpush.bf16.msrb.mxu0 %v1546_v45  ;;  %v2014_v41 = vor.u32 %v2276_v31, %v2011_v32  ;;  %v1598_v45 = vor.u32 %v2172_v33, %v1595_v35  ;;  %v2188_v25 = vld [vmem:[%s3344_s3 + $0x12c] sm:$0xf]  ;;  %v1659_v26 = vld [vmem:[%s3344_s3 + $0x138] sm:$0xf0]  ;;  %v1534_v31 = vor.u32 %v2156_v23, %v1531_v24 }
  0xa4   :  { %1048 = vmatpush.bf16.msrb.mxu1 %v1674_v46  ;;  %v1726_v46 = vor.u32 %v2204_v36, %v1723_v37  ;;  %v1662_v32 = vor.u32 %v2188_v25, %v1659_v26  ;;  %v2256_v33 = vld [vmem:[%s3344_s3 + $0x34c] sm:$0xf]  ;;  %v1515_v36 = vld [vmem:[%s3344_s3 + $0x18] sm:$0xf0] }
  0xa5   :  { %1012 = vmatmul.bf16.vlgmr.msra.gmra.mxu2 %v2876_v0  ;;  %v2152_v35 = vld [vmem:[%s3344_s3 + $0xc] sm:$0xf]  ;;  %v2286_v49 = vld [vmem:[%s3346_s5 + $0x38] sm:$0xff] }
  0xa6   :  { %1025 = vmatmul.bf16.vlgmr.msra.gmra.mxu3 %v2887_v6  ;;  %1060 = vmatpush.bf16.msrb.mxu2 %v1818_v53  ;;  %v1870_v53 = vor.u32 %v2240_v43, %v1867_v44  ;;  %v2184_v37 = vld [vmem:[%s3344_s3 + $0x10c] sm:$0xf]  ;;  %v1787_v44 = vld [vmem:[%s3344_s3 + $0x238] sm:$0xf0] }
  0xa7   :  { %1073 = vmatpush.bf16.msrb.mxu3 %v1946_v54  ;;  %1036 = vmatpush.bf16.msrb.mxu0 %v1530_v58  ;;  %v1998_v54 = vor.u32 %v2272_v47, %v1995_v48  ;;  %v1710_v58 = vor.u32 %v2200_v51, %v1707_v52  ;;  %v2220_v43 = vld [vmem:[%s3344_s3 + $0x22c] sm:$0xf]  ;;  %v1915_v48 = vld [vmem:[%s3344_s3 + $0x338] sm:$0xf0] }
  0xa8   :  { %1049 = vmatpush.bf16.msrb.mxu1 %v1658_v59  ;;  %v2268_v59 = vld [vmem:[%s3344_s3 + $0x3ac] sm:$0xf]  ;;  %v1790_v50 = vor.u32 %v2220_v43, %v1787_v44  ;;  %v1899_v55 = vld [vmem:[%s3344_s3 + $0x318] sm:$0xf0]  ;;  %v2307_v43 = vld [vmem:[%s3346_s5 + $0xe0] sm:$0xff] }
  0xa9   :  { %v2252_v47 = vld [vmem:[%s3344_s3 + $0x32c] sm:$0xf] }
  0xaa   :  { %1061 = vmatpush.bf16.msrb.mxu2 %v1802_v3  ;;  %v1982_v3 = vor.u32 %v2268_v59, %v1979_v60  ;;  %v1918_v51 = vor.u32 %v2252_v47, %v1915_v48  ;;  %v2216_v52 = vld [vmem:[%s3344_s3 + $0x20c] sm:$0xf]  ;;  %v2283_v60 = vld [vmem:[%s3346_s5 + $0x20] sm:$0xff]  ;;  %v2306_v48 = vld [vmem:[%s3346_s5 + $0xd8] sm:$0xff] }
  0xab   :  { %1074 = vmatpush.bf16.msrb.mxu3 %v1930_v8  ;;  %1037 = vmatpush.bf16.msrb.mxu0 %v1514_v11  ;;  %v1694_v8 = vor.u32 %v2196_v63, %v1691_v1  ;;  %v2160_v11 = vld [vmem:[%s3344_s3 + $0x4c] sm:$0xf]  ;;  %v2279_v63 = vld [vmem:[%s3346_s5] sm:$0xff] }
  0xac   :  { %1050 = vmatpush.bf16.msrb.mxu1 %v1642_v12  ;;  %v1547_v12 = vld [vmem:[%s3344_s3 + $0x58] sm:$0xf0]  ;;  %v2284_v59 = vld [vmem:[%s3346_s5 + $0x28] sm:$0xff]  ;;  %v2291_v1 = vld [vmem:[%s3346_s5 + $0x60] sm:$0xff] }
  0xad   :  { %v1550_v19 = vor.u32 %v2160_v11, %v1547_v12  ;;  %v2280_v61 = vld [vmem:[%s3346_s5 + $0x8] sm:$0xff]  ;;  %v2287_v12 = vld [vmem:[%s3346_s5 + $0x40] sm:$0xff] }
  0xae   :  { %1062 = vmatpush.bf16.msrb.mxu2 %v1786_v18  ;;  %1038 = vmatmul.bf16.vlgmr.msrb.gmra.mxu0 %v2834_v38  ;;  %v1819_v18 = vld [vmem:[%s3344_s3 + $0x278] sm:$0xf0]  ;;  %v2292_v62 = vld [vmem:[%s3346_s5 + $0x68] sm:$0xff] }
  0xaf   :  { %1082 = vmatpush.bf16.msra.mxu0 %v1630_v15  ;;  %1075 = vmatpush.bf16.msrb.mxu3 %v1914_v22  ;;  %v1838_v15 = vor.u32 %v2232_v4, %v1835_v5  ;;  %v1947_v22 = vld [vmem:[%s3344_s3 + $0x378] sm:$0xf0]  ;;  %v1822_v27 = vor.u32 %v2228_v17, %v1819_v18  ;;  %v2289_v4 = vld [vmem:[%s3346_s5 + $0x50] sm:$0xff] }
  0xb0   :  { %1095 = vmatpush.bf16.msra.mxu1 %v1758_v16  ;;  %v1966_v16 = vor.u32 %v2264_v9, %v1963_v10  ;;  %v1950_v28 = vor.u32 %v2260_v21, %v1947_v22  ;;  %v2301_v5 = vld [vmem:[%s3346_s5 + $0xb0] sm:$0xff]  ;;  %v3287_v9 = vld [vmem:[%s3345_s4] sm:$0xf]  ;;  %v2296_v22 = vld [vmem:[%s3346_s5 + $0x88] sm:$0xff] }
  0xb1   :  { %1051 = vmatmul.bf16.vlgmr.msrb.gmra.mxu1 %v2842_v42  ;;  %v278_v14 = vperm.slane %v3287_v9, 0 }
  0xb2   :  { %1063 = vmatpush.bf16.msrb.mxu2 %v1770_v34  ;;  %v1931_v34 = vld [vmem:[%s3344_s3 + $0x358] sm:$0xf0] }
  0xb3   :  { %1083 = vmatpush.bf16.msra.mxu0 %v1614_v29  ;;  %1076 = vmatpush.bf16.msrb.mxu3 %v1898_v39  ;;  %v2224_v29 = vld [vmem:[%s3344_s3 + $0x24c] sm:$0xf]  ;;  %v1643_v39 = vld [vmem:[%s3344_s3 + $0x118] sm:$0xf0] }
  0xb4   :  { %1096 = vmatpush.bf16.msra.mxu1 %v1742_v30  ;;  %v1803_v30 = vld [vmem:[%s3344_s3 + $0x258] sm:$0xf0] }
  0xb5   :  { %1064 = vmatmul.bf16.vlgmr.msrb.gmra.mxu2 %v2876_v0 }
  0xb6   :  { %1108 = vmatpush.bf16.msra.mxu2 %v1886_v40  ;;  %1077 = vmatmul.bf16.vlgmr.msrb.gmra.mxu3 %v2887_v6  ;;  %v1806_v40 = vor.u32 %v2224_v29, %v1803_v30  ;;  %v2310_v29 = vld [vmem:[%s3346_s5 + $0xf8] sm:$0xff] }
  0xb7   :  { %1121 = vmatpush.bf16.msra.mxu3 %v2014_v41  ;;  %1084 = vmatpush.bf16.msra.mxu0 %v1598_v45  ;;  %v1934_v41 = vor.u32 %v2256_v33, %v1931_v34  ;;  %v1518_v45 = vor.u32 %v2152_v35, %v1515_v36  ;;  %v2309_v33 = vld [vmem:[%s3346_s5 + $0xf0] sm:$0xff]  ;;  %v2308_v35 = vld [vmem:[%s3346_s5 + $0xe8] sm:$0xff] }
  0xb8   :  { %1097 = vmatpush.bf16.msra.mxu1 %v1726_v46  ;;  %v1646_v46 = vor.u32 %v2184_v37, %v1643_v39 }
  0xba   :  { %1109 = vmatpush.bf16.msra.mxu2 %v1870_v53  ;;  %v1771_v53 = vld [vmem:[%s3344_s3 + $0x218] sm:$0xf0] }
  0xbb   :  { %1122 = vmatpush.bf16.msra.mxu3 %v1998_v54  ;;  %1085 = vmatpush.bf16.msra.mxu0 %v1582_v57  ;;  %v2248_v54 = vld [vmem:[%s3344_s3 + $0x30c] sm:$0xf]  ;;  %v1774_v57 = vor.u32 %v2216_v52, %v1771_v53  ;;  %v2305_v53 = vld [vmem:[%s3346_s5 + $0xd0] sm:$0xff] }
  0xbc   :  { %1098 = vmatpush.bf16.msra.mxu1 %v1710_v58  ;;  %v1902_v58 = vor.u32 %v2248_v54, %v1899_v55 }
  0xbe   :  { %1110 = vmatpush.bf16.msra.mxu2 %v1854_v2  ;;  %v2290_v2 = vld [vmem:[%s3346_s5 + $0x58] sm:$0xff] }
  0xbf   :  { %1123 = vmatpush.bf16.msra.mxu3 %v1982_v3  ;;  %1086 = vmatpush.bf16.msra.mxu0 %v1566_v7  ;;  %v2302_v3 = vld [vmem:[%s3346_s5 + $0xb8] sm:$0xff]  ;;  %v2288_v7 = vld [vmem:[%s3346_s5 + $0x48] sm:$0xff] }
  0xc0   :  { %1099 = vmatpush.bf16.msra.mxu1 %v1694_v8  ;;  %v2300_v8 = vld [vmem:[%s3346_s5 + $0xa8] sm:$0xff] }
  0xc2   :  { %1111 = vmatpush.bf16.msra.mxu2 %v1838_v15  ;;  %v2298_v15 = vld [vmem:[%s3346_s5 + $0x98] sm:$0xff] }
  0xc3   :  { %1124 = vmatpush.bf16.msra.mxu3 %v1966_v16  ;;  %1087 = vmatpush.bf16.msra.mxu0 %v1550_v19  ;;  %v2297_v19 = vld [vmem:[%s3346_s5 + $0x90] sm:$0xff] }
  0xc4   :  { %1100 = vmatpush.bf16.msra.mxu1 %v1678_v20 }
  0xc6   :  { %1112 = vmatpush.bf16.msra.mxu2 %v1822_v27 }
  0xc7   :  { %1125 = vmatpush.bf16.msra.mxu3 %v1950_v28  ;;  %1088 = vmatpush.bf16.msra.mxu0 %v1534_v31  ;;  %v2295_v28 = vld [vmem:[%s3346_s5 + $0x80] sm:$0xff]  ;;  %v279_v31 = vperm.slane %v3287_v9, 1 }
  0xc8   :  { %1101 = vmatpush.bf16.msra.mxu1 %v1662_v32 }
  0xca   :  { %1113 = vmatpush.bf16.msra.mxu2 %v1806_v40 }
  0xcb   :  { %1126 = vmatpush.bf16.msra.mxu3 %v1934_v41  ;;  %1089 = vmatpush.bf16.msra.mxu0 %v1518_v45 }
  0xcc   :  { %1102 = vmatpush.bf16.msra.mxu1 %v1646_v46 }
  0xce   :  { %1114 = vmatpush.bf16.msra.mxu2 %v1790_v50  ;;  %1090 = vmatmul.bf16.vlgmr.msra.gmra.mxu0 %v2834_v38  ;;  %v2282_v38 = vld [vmem:[%s3346_s5 + $0x18] sm:$0xff] }
  0xcf   :  { %1398 = vmatpush.bf16.msrb.mxu0 %v2286_v49  ;;  %1127 = vmatpush.bf16.msra.mxu3 %v1918_v51  ;;  %v280_v51 = vperm.slane %v3287_v9, 2 }
  0xd0   :  { %1103 = vmatmul.bf16.vlgmr.msra.gmra.mxu1 %v2842_v42  ;;  %v2294_v42 = vld [vmem:[%s3346_s5 + $0x78] sm:$0xff] }
  0xd1   :  { %1411 = vmatpush.bf16.msrb.mxu1 %v2294_v42 }
  0xd2   :  { %1115 = vmatpush.bf16.msra.mxu2 %v1774_v57  ;;  %v2304_v57 = vld [vmem:[%s3346_s5 + $0xc8] sm:$0xff] }
  0xd3   :  { %1399 = vmatpush.bf16.msrb.mxu0 %v2285_v56  ;;  %1128 = vmatpush.bf16.msra.mxu3 %v1902_v58 }
  0xd5   :  { %1116 = vmatmul.bf16.vlgmr.msra.gmra.mxu2 %v2876_v0  ;;  %v2281_v0 = vld [vmem:[%s3346_s5 + $0x10] sm:$0xff] }
  0xd6   :  { %1129 = vmatmul.bf16.vlgmr.msra.gmra.mxu3 %v2887_v6  ;;  %v2293_v6 = vld [vmem:[%s3346_s5 + $0x70] sm:$0xff]  ;;  %1424 = vmatpush.bf16.msrb.mxu2 %v2302_v3  ;;  %v281_v3 = vperm.slane %v3287_v9, 3  ;;  %v2312_v9 = vld [vmem:[%s3347_s6] ss:$0 sm:$0xff] }
  0xd7   :  { %1400 = vmatpush.bf16.msrb.mxu0 %v2284_v59  ;;  %1412 = vmatpush.bf16.msrb.mxu1 %v2293_v6 }
  0xd8   :  { %1437 = vmatpush.bf16.msrb.mxu3 %v2310_v29 }
  0xda   :  { %1425 = vmatpush.bf16.msrb.mxu2 %v2301_v5 }
  0xdb   :  { %1401 = vmatpush.bf16.msrb.mxu0 %v2283_v60  ;;  %1413 = vmatpush.bf16.msrb.mxu1 %v2292_v62  ;;  %v2303_v60 = vld [vmem:[%s3346_s5 + $0xc0] sm:$0xff] }
  0xdc   :  { %1438 = vmatpush.bf16.msrb.mxu3 %v2309_v33 }
  0xde   :  { %1426 = vmatpush.bf16.msrb.mxu2 %v2300_v8 }
  0xdf   :  { %1402 = vmatpush.bf16.msrb.mxu0 %v2282_v38  ;;  %1414 = vmatpush.bf16.msrb.mxu1 %v2291_v1 }
  0xe0   :  { %1439 = vmatpush.bf16.msrb.mxu3 %v2308_v35 }
  0xe2   :  { %1427 = vmatpush.bf16.msrb.mxu2 %v2299_v13 }
  0xe3   :  { %1403 = vmatpush.bf16.msrb.mxu0 %v2281_v0  ;;  %1415 = vmatpush.bf16.msrb.mxu1 %v2290_v2 }
  0xe4   :  { %1440 = vmatpush.bf16.msrb.mxu3 %v2307_v43 }
  0xe6   :  { %1428 = vmatpush.bf16.msrb.mxu2 %v2298_v15 }
  0xe7   :  { %1404 = vmatpush.bf16.msrb.mxu0 %v2280_v61  ;;  %1416 = vmatpush.bf16.msrb.mxu1 %v2289_v4 }
  0xe8   :  { %1441 = vmatpush.bf16.msrb.mxu3 %v2306_v48 }
  0xea   :  { %1429 = vmatpush.bf16.msrb.mxu2 %v2297_v19 }
  0xeb   :  { %1405 = vmatpush.bf16.msrb.mxu0 %v2279_v63  ;;  %1417 = vmatpush.bf16.msrb.mxu1 %v2288_v7 }
  0xec   :  { %1442 = vmatpush.bf16.msrb.mxu3 %v2305_v53 }
  0xee   :  { %1430 = vmatpush.bf16.msrb.mxu2 %v2296_v22 }
  0xef   :  { %1418 = vmatpush.bf16.msrb.mxu1 %v2287_v12 }
  0xf0   :  { %1443 = vmatpush.bf16.msrb.mxu3 %v2304_v57 }
  0xf2   :  { %1431 = vmatpush.bf16.msrb.mxu2 %v2295_v28 }
  0xf4   :  { %1444 = vmatpush.bf16.msrb.mxu3 %v2303_v60 }
 0x10a   :  { %v935_v10 = vpop.f32.mrf.mxu0 }
 0x10b   :  { %v948_v11 = vpop.f32.mrf.mxu1  ;;  %v936_v16 = vadd.f32 %v935_v10, %v278_v14 }
 0x10d   :  { %v949_v20 = vadd.f32 %v948_v11, %v936_v16 }
 0x112   :  { %v937_v17 = vpop.f32.mrf.mxu0 }
 0x113   :  { %v950_v18 = vpop.f32.mrf.mxu1 }
 0x118   :  { %v961_v21 = vpop.f32.mrf.mxu2 }
 0x119   :  { %v962_v23 = vadd.f32 %v961_v21, %v949_v20  ;;  %v974_v24 = vpop.f32.mrf.mxu3 }
 0x11a   :  { %v987_v26 = vpop.f32.mrf.mxu0 }
 0x11b   :  { %v975_v25 = vadd.f32 %v974_v24, %v962_v23  ;;  %v1000_v27 = vpop.f32.mrf.mxu1  ;;  %v988_v36 = vadd.f32 %v987_v26, %v279_v31 }
 0x11d   :  { %v1134_v30 = vpack.c.bf16 %v975_v25, %v975_v25  ;;  %v1001_v40 = vadd.f32 %v1000_v27, %v988_v36 }
 0x11f   :  { %1406 = vmatmul.bf16.vlgmr.msrb.gmra.mxu0 %v1134_v30 }
 0x120   :  { %v963_v32 = vpop.f32.mrf.mxu2 }
 0x121   :  { %v976_v34 = vpop.f32.mrf.mxu3 }
 0x122   :  { %v989_v37 = vpop.f32.mrf.mxu0 }
 0x123   :  { %v1002_v39 = vpop.f32.mrf.mxu1 }
 0x128   :  { %v1013_v41 = vpop.f32.mrf.mxu2 }
 0x129   :  { %v1014_v44 = vadd.f32 %v1013_v41, %v1001_v40  ;;  %v1026_v45 = vpop.f32.mrf.mxu3 }
 0x12b   :  { %v1027_v46 = vadd.f32 %v1026_v45, %v1014_v44  ;;  %v1039_v47 = vpop.f32.mrf.mxu0 }
 0x12c   :  { %v1040_v55 = vadd.f32 %v1039_v47, %v280_v51 }
 0x12d   :  { %v1135_v49 = vpack.c.bf16 %v1027_v46, %v1027_v46 }
 0x12e   :  { %v1052_v50 = vpop.f32.mrf.mxu1 }
 0x12f   :  { %1419 = vmatmul.bf16.vlgmr.msrb.gmra.mxu1 %v1135_v49  ;;  %v1053_v59 = vadd.f32 %v1052_v50, %v1040_v55 }
 0x130   :  { %v1015_v52 = vpop.f32.mrf.mxu2 }
 0x131   :  { %v1028_v54 = vpop.f32.mrf.mxu3 }
 0x133   :  { %v1041_v56 = vpop.f32.mrf.mxu0 }
 0x136   :  { %v1054_v58 = vpop.f32.mrf.mxu1 }
 0x138   :  { %v1065_v38 = vpop.f32.mrf.mxu2 }
 0x139   :  { %v1078_v42 = vpop.f32.mrf.mxu3  ;;  %v1066_v0 = vadd.f32 %v1065_v38, %v1053_v59 }
 0x13b   :  { %v1079_v6 = vadd.f32 %v1078_v42, %v1066_v0 }
 0x13d   :  { %v1136_v61 = vpack.c.bf16 %v1079_v6, %v1079_v6 }
 0x13f   :  { %1432 = vmatmul.bf16.vlgmr.msrb.gmra.mxu2 %v1136_v61 }
 0x140   :  { %v1067_v62 = vpop.f32.mrf.mxu2 }
 0x141   :  { %v1080_v63 = vpop.f32.mrf.mxu3 }
 0x14b   :  { %v1091_v1 = vpop.f32.mrf.mxu0 }
 0x14c   :  { %v1092_v4 = vadd.f32 %v1091_v1, %v281_v3 }
 0x14d   :  { %v1104_v2 = vpop.f32.mrf.mxu1 }
 0x14e   :  { %v1105_v8 = vadd.f32 %v1104_v2, %v1092_v4 }
 0x153   :  { %v1093_v5 = vpop.f32.mrf.mxu0 }
 0x155   :  { %v1106_v7 = vpop.f32.mrf.mxu1 }
 0x158   :  { %v1117_v10 = vpop.f32.mrf.mxu2 }
 0x159   :  { %v1118_v11 = vadd.f32 %v1117_v10, %v1105_v8  ;;  %v1130_v12 = vpop.f32.mrf.mxu3 }
 0x15b   :  { %v1131_v13 = vadd.f32 %v1130_v12, %v1118_v11 }
 0x15d   :  { %v1137_v14 = vpack.c.bf16 %v1131_v13, %v1131_v13 }
 0x15f   :  { %1445 = vmatmul.bf16.vlgmr.msrb.gmra.mxu3 %v1137_v14 }
 0x160   :  { %v1119_v15 = vpop.f32.mrf.mxu2 }
 0x161   :  { %v1132_v16 = vpop.f32.mrf.mxu3 }
 0x19c   :  { %v1407_v17 = vpop.f32.mrf.mxu0 }
 0x19d   :  { %v1408_v23 = vadd.f32 %v2312_v9, %v1407_v17 }
 0x1a4   :  { %v1409_v18 = vpop.f32.mrf.mxu0 }
 0x1ac   :  { %v1420_v19 = vpop.f32.mrf.mxu1 }
 0x1ad   :  { %v1421_v24 = vadd.f32 %v1420_v19, %v1408_v23 }
 0x1b4   :  { %v1422_v20 = vpop.f32.mrf.mxu1 }
 0x1c2   :  { %v1433_v21 = vpop.f32.mrf.mxu2 }
 0x1c3   :  { %v1434_v25 = vadd.f32 %v1433_v21, %v1421_v24 }
 0x1ca   :  { %v1435_v22 = vpop.f32.mrf.mxu2 }
 0x1e2   :  { %v1446_v26 = vpop.f32.mrf.mxu3 }
 0x1e3   :  { %v1447_v27 = vadd.f32 %v1446_v26, %v1434_v25 }
 0x1e5   :  { %1450 = vst [vmem:[#allocation2] sm:$0xff] %v1447_v27 }
 0x1e6   :  { %1461 = dma.vmem_to_hbm [thread:$0]  %s1457_s2, 128, %s1459_s28, [#allocation3]  }
 0x1ea   :  { %v1448_v28 = vpop.f32.mrf.mxu3 }
 0x1eb   :  { %2337 = dma.done.wait [#allocation3], 128  }
 0x1ec   :  { %2338 = vsyncadd [#allocation3], 4294967168 }
 0x1ed   :  { %1466 = vsyncpa [#allocation3], 1 }

</bundles_post_ra>
